<compile_context>
chip_gen: v6e
topology: v6e:2x2x1
jax: 0.10.0
libtpu: 0.0.40
codegen_flags: <defaults>
</compile_context>

<pallas_src>
import jax
import jax.numpy as jnp
from jax.experimental import pallas as pl
from jax.experimental.pallas import tpu as pltpu

_VMEM_LIMIT_BYTES = 48 * 1024 * 1024      # scoped-VMEM ceiling (safe under v7x 64 MiB physical)
_FUSED_VMEM_BUDGET = 20 * 1024 * 1024     # auto-select fully-fused single-kernel path under this
_FEAT_RESIDENT_BUDGET = 16 * 1024 * 1024  # keep whole feature matrix VMEM-resident under this


def _round_up(x, m):
    return ((x + m - 1) // m) * m


def _pick_tile(n, candidates, cap):
    for c in candidates:
        if c <= cap and n % c == 0:
            return c
    return min(n, cap)


def _pad_cast(a, shape, dtype):
    """Cast + zero-pad, skipping whatever work is unnecessary."""
    a = a.astype(dtype)
    if a.shape == tuple(shape):
        return a
    idx = tuple(slice(0, s) for s in a.shape)
    return jnp.zeros(shape, dtype).at[idx].set(a)


# --------------------------------------------------------------------------- #
# Fully-fused single-kernel path (graph + intermediates fit in VMEM)           #
# --------------------------------------------------------------------------- #
def _fused_kernel(adj_ref, x_ref, w1_ref, b1_ref, w2_ref, b2_ref, o_ref):
    mxu = adj_ref.dtype
    xw1 = jnp.dot(x_ref[...], w1_ref[...], preferred_element_type=jnp.float32)
    h = jnp.dot(adj_ref[...], xw1.astype(mxu), preferred_element_type=jnp.float32)
    h = jnp.maximum(h + b1_ref[...], 0.0)
    # dropout(training=False) between the layers is the identity.
    hw2 = jnp.dot(h.astype(mxu), w2_ref[...], preferred_element_type=jnp.float32)
    out = jnp.dot(adj_ref[...], hw2.astype(mxu), preferred_element_type=jnp.float32)
    o_ref[...] = (out + b2_ref[...]).astype(o_ref.dtype)


def _fused_forward(adj_p, x_p, w1_p, b1_p, w2_p, b2_p):
    n_pad, in_pad = x_p.shape
    hid_pad = w1_p.shape[1]
    out_pad = w2_p.shape[1]
    flops = (2 * n_pad * in_pad * hid_pad + 2 * n_pad * n_pad * hid_pad
             + 2 * n_pad * hid_pad * out_pad + 2 * n_pad * n_pad * out_pad)
    bytes_accessed = int(
        adj_p.size * adj_p.dtype.itemsize + x_p.size * x_p.dtype.itemsize
        + w1_p.size * w1_p.dtype.itemsize + w2_p.size * w2_p.dtype.itemsize
        + (hid_pad + out_pad) * 4 + n_pad * out_pad * 4)
    return pl.pallas_call(
        _fused_kernel,
        out_shape=jax.ShapeDtypeStruct((n_pad, out_pad), jnp.float32),
        grid=(1,),
        in_specs=[
            pl.BlockSpec((n_pad, n_pad), lambda i: (0, 0)),
            pl.BlockSpec((n_pad, in_pad), lambda i: (0, 0)),
            pl.BlockSpec((in_pad, hid_pad), lambda i: (0, 0)),
            pl.BlockSpec((1, hid_pad), lambda i: (0, 0)),
            pl.BlockSpec((hid_pad, out_pad), lambda i: (0, 0)),
            pl.BlockSpec((1, out_pad), lambda i: (0, 0)),
        ],
        out_specs=pl.BlockSpec((n_pad, out_pad), lambda i: (0, 0)),
        compiler_params=pltpu.CompilerParams(
            dimension_semantics=("arbitrary",),
            vmem_limit_bytes=_VMEM_LIMIT_BYTES,
        ),
        cost_estimate=pl.CostEstimate(
            flops=flops, transcendentals=0, bytes_accessed=bytes_accessed),
    )(adj_p, x_p, w1_p, b1_p, w2_p, b2_p)


# --------------------------------------------------------------------------- #
# Kernel 1 (tiled path): dense feature matmul  out[i-block] = x[i-block] @ w   #
# --------------------------------------------------------------------------- #
def _dense_matmul_kernel(x_ref, w_ref, o_ref):
    o_ref[...] = jnp.dot(
        x_ref[...], w_ref[...], preferred_element_type=jnp.float32
    ).astype(o_ref.dtype)


def _dense_matmul(x, w, *, out_dtype, tm):
    n, f_in = x.shape
    f_out = w.shape[1]
    flops = 2 * n * f_in * f_out
    bytes_accessed = int(
        n * f_in * x.dtype.itemsize + f_in * f_out * w.dtype.itemsize
        + n * f_out * jnp.dtype(out_dtype).itemsize)
    return pl.pallas_call(
        _dense_matmul_kernel,
        out_shape=jax.ShapeDtypeStruct((n, f_out), out_dtype),
        grid=(n // tm,),
        in_specs=[
            pl.BlockSpec((tm, f_in), lambda i: (i, 0)),     # row block of x
            pl.BlockSpec((f_in, f_out), lambda i: (0, 0)),  # small weight, resident
        ],
        out_specs=pl.BlockSpec((tm, f_out), lambda i: (i, 0)),
        compiler_params=pltpu.CompilerParams(
            dimension_semantics=("parallel",),
            vmem_limit_bytes=_VMEM_LIMIT_BYTES,
        ),
        cost_estimate=pl.CostEstimate(
            flops=flops, transcendentals=0, bytes_accessed=bytes_accessed),
    )(x, w)


# --------------------------------------------------------------------------- #
# Kernel 2/3 (tiled path): out = [relu](A_hat @ feat + b) [@ W_epi]            #
#   grid = (N/TM, N/TK); f32 accumulator, finalize at k == last.               #
# --------------------------------------------------------------------------- #
def _make_propagate_kernel(apply_relu, fuse_epilogue, feat_resident, tk):
    def _body(adj_ref, feat_ref, b_ref, w_epi_ref, o_ref, acc_ref):
        k = pl.program_id(1)

        if feat_resident:
            # Feature matrix is loaded once and resident in VMEM; slice per k.
            start = pl.multiple_of(k * tk, tk)
            feat_blk = feat_ref[pl.ds(start, tk), :]
        else:
            feat_blk = feat_ref[...]

        prod = jnp.dot(adj_ref[...], feat_blk, preferred_element_type=jnp.float32)

        @pl.when(k == 0)
        def _():
            acc_ref[...] = prod            # write-through: no zeros-then-add RMW

        @pl.when(k > 0)
        def _():
            acc_ref[...] += prod

        @pl.when(k == pl.num_programs(1) - 1)
        def _():
            res = acc_ref[...] + b_ref[...]     # bias added once, in f32
            if apply_relu:
                res = jnp.maximum(res, 0.0)
            if fuse_epilogue:
                res = jnp.dot(res.astype(w_epi_ref.dtype), w_epi_ref[...],
                              preferred_element_type=jnp.float32)
            o_ref[...] = res.astype(o_ref.dtype)

    if fuse_epilogue:
        def kernel(adj_ref, feat_ref, b_ref, w_epi_ref, o_ref, acc_ref):
            _body(adj_ref, feat_ref, b_ref, w_epi_ref, o_ref, acc_ref)
    else:
        def kernel(adj_ref, feat_ref, b_ref, o_ref, acc_ref):
            _body(adj_ref, feat_ref, b_ref, None, o_ref, acc_ref)
    return kernel


def _propagate(adj, feat, bias, w_epi, *, apply_relu, out_dtype, tm, tk,
               feat_resident):
    n = adj.shape[0]
    f_feat = feat.shape[1]
    fuse_epilogue = w_epi is not None
    f_out = w_epi.shape[1] if fuse_epilogue else f_feat
    ni, nk = n // tm, n // tk

    if feat_resident:
        # Full-extent, constant-index block: DMA'd once, resident in VMEM.
        feat_spec = pl.BlockSpec((n, f_feat), lambda i, k: (0, 0))
        feat_bytes = n * f_feat * feat.dtype.itemsize
    else:
        feat_spec = pl.BlockSpec((tk, f_feat), lambda i, k: (k, 0))
        feat_bytes = ni * n * f_feat * feat.dtype.itemsize

    in_specs = [
        pl.BlockSpec((tm, tk), lambda i, k: (i, k)),     # adjacency tile (streams)
        feat_spec,                                        # features
        pl.BlockSpec((1, f_feat), lambda i, k: (0, 0)),   # bias (resident)
    ]
    operands = [adj, feat, bias]
    if fuse_epilogue:
        in_specs.append(pl.BlockSpec((f_feat, f_out), lambda i, k: (0, 0)))
        operands.append(w_epi)

    flops = 2 * n * n * f_feat + (2 * n * f_feat * f_out if fuse_epilogue else 0)
    bytes_accessed = int(
        n * n * adj.dtype.itemsize                     # adjacency streamed once
        + feat_bytes
        + n * f_out * jnp.dtype(out_dtype).itemsize)

    return pl.pallas_call(
        _make_propagate_kernel(apply_relu, fuse_epilogue, feat_resident, tk),
        out_shape=jax.ShapeDtypeStruct((n, f_out), out_dtype),
        grid=(ni, nk),
        in_specs=in_specs,
        out_specs=pl.BlockSpec((tm, f_out), lambda i, k: (i, 0)),
        scratch_shapes=[pltpu.VMEM((tm, f_feat), jnp.float32)],
        compiler_params=pltpu.CompilerParams(
            dimension_semantics=("parallel", "arbitrary"),
            vmem_limit_bytes=_VMEM_LIMIT_BYTES,
        ),
        cost_estimate=pl.CostEstimate(
            flops=flops, transcendentals=0, bytes_accessed=bytes_accessed),
    )(*operands)


# --------------------------------------------------------------------------- #
# Full forward                                                                 #
# --------------------------------------------------------------------------- #
def multimodal_gnn_forward(adj_hat, x, w1, b1, w2, b2, *,
                           mxu_dtype=jnp.bfloat16,
                           fused=None, feat_resident=None, tm=None, tk=None):
    n, in_dim = x.shape
    hid = w1.shape[1]
    out_dim = w2.shape[1]

    # Lane-dense padding: every matmul dim becomes a multiple of 128.
    n_pad = _round_up(n, 128)
    in_pad = _round_up(in_dim, 128)
    hid_pad = _round_up(hid, 128)
    out_pad = _round_up(out_dim, 128)

    # Pad/cast (skipped when already aligned & cast; cache adj_p for static graphs).
    adj_p = _pad_cast(adj_hat, (n_pad, n_pad), mxu_dtype)
    x_p = _pad_cast(x, (n_pad, in_pad), mxu_dtype)
    w1_p = _pad_cast(w1, (in_pad, hid_pad), mxu_dtype)
    w2_p = _pad_cast(w2, (hid_pad, out_pad), mxu_dtype)
    b1_p = _pad_cast(jnp.reshape(b1, (1, -1)), (1, hid_pad), jnp.float32)
    b2_p = _pad_cast(jnp.reshape(b2, (1, -1)), (1, out_pad), jnp.float32)

    if fused is None:
        # Rough VMEM estimate: bf16 inputs + f32 output + in-kernel f32/bf16 temps.
        fused_bytes = (2 * n_pad * n_pad
                       + 2 * n_pad * in_pad
                       + 2 * (in_pad * hid_pad + hid_pad * out_pad)
                       + 6 * n_pad * hid_pad
                       + 10 * n_pad * out_pad)
        fused = fused_bytes <= _FUSED_VMEM_BUDGET

    if fused:
        out_p = _fused_forward(adj_p, x_p, w1_p, b1_p, w2_p, b2_p)
        return out_p[:n, :out_dim]

    # ---- tiled 3-kernel path ------------------------------------------------
    tm_cap = n_pad // 2 if n_pad >= 256 else n_pad   # keep >=2 row blocks (v7x 2 TCs)
    if tm is None:
        tm = _pick_tile(n_pad, (512, 256, 128), cap=tm_cap)
    if tk is None:
        tk = _pick_tile(n_pad, (2048, 1024, 512, 256, 128), cap=n_pad)

    if feat_resident is None:
        feat_resident = (n_pad * max(hid_pad, out_pad)
                         * jnp.dtype(mxu_dtype).itemsize) <= _FEAT_RESIDENT_BUDGET

    # 1) XW1 = X @ W1  (computed once; only adjacency streams afterwards)
    xw1 = _dense_matmul(x_p, w1_p, out_dtype=mxu_dtype, tm=tm)

    # 2) HW2 = relu(A_hat @ XW1 + b1) @ W2   (layer-2 linear fused into finalize).
    #    dropout(training=False) between the layers is the identity.
    hw2 = _propagate(adj_p, xw1, b1_p, w2_p, apply_relu=True,
                     out_dtype=mxu_dtype, tm=tm, tk=tk,
                     feat_resident=feat_resident)

    # 3) OUT = A_hat @ HW2 + b2
    out_p = _propagate(adj_p, hw2, b2_p, None, apply_relu=False,
                       out_dtype=jnp.float32, tm=tm, tk=tk,
                       feat_resident=feat_resident)

    return out_p[:n, :out_dim]


def gcn_normalized_adjacency(edge_index, num_nodes):
    """Dense A_hat = D^-1/2 (A + remaining self loops) D^-1/2 (PyG gcn_norm).

    Duplicate edges are summed, and a self-loop of weight 1 is added only for
    nodes that do not already have one (add_remaining_self_loops).
    """
    src, dst = edge_index[0], edge_index[1]
    adj = jnp.zeros((num_nodes, num_nodes), jnp.float32)
    adj = adj.at[dst, src].add(1.0)          # message flow src -> dst
    diag = jnp.diagonal(adj)
    adj = adj + jnp.diag(jnp.where(diag == 0.0, 1.0, 0.0))
    deg = adj.sum(axis=1)
    dinv = jnp.where(deg > 0, 1.0 / jnp.sqrt(deg), 0.0)
    return dinv[:, None] * adj * dinv[None, :]


# --------------------------------------------------------------------------- #
# Self-test                                                                    #
# --------------------------------------------------------------------------- #
def _reference(adj_hat, x, w1, b1, w2, b2, *, mirror_bf16):
    hi = jax.lax.Precision.HIGHEST
    mm = lambda a, b: jnp.matmul(a, b, precision=hi)
    if mirror_bf16:
        r = lambda a: a.astype(jnp.bfloat16).astype(jnp.float32)
    else:
        r = lambda a: a
    adj_r, x_r, w1_r, w2_r = r(adj_hat), r(x), r(w1), r(w2)
    xw1 = r(mm(x_r, w1_r))
    h = r(jnp.maximum(mm(adj_r, xw1) + b1, 0.0))
    hw2 = r(mm(h, w2_r))
    return mm(adj_r, hw2) + b2


if __name__ == "__main__":
    key = jax.random.PRNGKey(0)
    k_w1, k_b1, k_w2, k_b2, k_small, k_big = jax.random.split(key, 6)

    INPUT_DIM, HIDDEN_DIM, OUTPUT_DIM = 8, 32, 8

    w1 = jax.random.normal(k_w1, (INPUT_DIM, HIDDEN_DIM), jnp.float32) / jnp.sqrt(
        float(INPUT_DIM))
    b1 = 0.1 * jax.random.normal(k_b1, (HIDDEN_DIM,), jnp.float32)
    w2 = jax.random.normal(k_w2, (HIDDEN_DIM, OUTPUT_DIM), jnp.float32) / jnp.sqrt(
        float(HIDDEN_DIM))
    b2 = 0.1 * jax.random.normal(k_b2, (OUTPUT_DIM,), jnp.float32)

    def make_graph(k, n, num_edges):
        kx, ke = jax.random.split(k)
        xg = jax.random.normal(kx, (n, INPUT_DIM), jnp.float32)
        edge_index = jax.random.randint(ke, (2, num_edges), 0, n, dtype=jnp.int32)
        return xg, gcn_normalized_adjacency(edge_index, n)

    def check(out, adj, xg, name):
        ref_b = _reference(adj, xg, w1, b1, w2, b2, mirror_bf16=True)
        ref_f = _reference(adj, xg, w1, b1, w2, b2, mirror_bf16=False)
        assert out.shape == ref_b.shape, (name, out.shape)
        assert jnp.allclose(out, ref_b, atol=5e-3, rtol=5e-3), (
            name, float(jnp.max(jnp.abs(out - ref_b))))
        assert jnp.allclose(out, ref_f, atol=1.5e-1, rtol=1e-1), (
            name, float(jnp.max(jnp.abs(out - ref_f))))

    # 1) Small graph (module-scale shapes) -> fully-fused single-kernel path.
    x_s, adj_s = make_graph(k_small, 16, 32)
    out = jax.block_until_ready(multimodal_gnn_forward(adj_s, x_s, w1, b1, w2, b2))
    check(out, adj_s, x_s, "fused")

    # 2) Larger graph -> tiled 3-kernel path, resident features, single k block.
    x_b, adj_b = make_graph(k_big, 512, 4096)
    out = jax.block_until_ready(
        multimodal_gnn_forward(adj_b, x_b, w1, b1, w2, b2, fused=False))
    check(out, adj_b, x_b, "tiled")

    # 3) Multi-k accumulation over the adjacency (resident feature slicing).
    out = jax.block_until_ready(
        multimodal_gnn_forward(adj_b, x_b, w1, b1, w2, b2,
                               fused=False, tm=128, tk=128))
    check(out, adj_b, x_b, "tiled-multik")

    # 4) Streamed-feature fallback (used when features do not fit the VMEM budget).
    out = jax.block_until_ready(
        multimodal_gnn_forward(adj_b, x_b, w1, b1, w2, b2,
                               fused=False, tm=128, tk=128, feat_resident=False))
    check(out, adj_b, x_b, "tiled-streamed")

    print("KERNEL_OK")
</pallas_src>

<mosaic_0001>
module attributes {stable_mosaic.version = 11 : i64} {
  func.func @_fused_kernel(%arg0: i32, %arg1: memref<128x128xbf16, #tpu.memory_space<vmem>>, %arg2: memref<128x128xbf16, #tpu.memory_space<vmem>>, %arg3: memref<128x128xbf16, #tpu.memory_space<vmem>>, %arg4: memref<1x128xf32, #tpu.memory_space<vmem>>, %arg5: memref<128x128xbf16, #tpu.memory_space<vmem>>, %arg6: memref<1x128xf32, #tpu.memory_space<vmem>>, %arg7: memref<128x128xf32, #tpu.memory_space<vmem>>) attributes {dimension_semantics = [#tpu.dimension_semantics<arbitrary>], iteration_bounds = array<i64: 1>, scalar_prefetch = 0 : i64, scratch_operands = 0 : i64, tpu.core_type = #tpu.core_type<tc>, window_params = [{pipeline_mode = #tpu.pipeline_mode<synchronous>, transform_indices = @transform_0, window_bounds = array<i64: 128, 128>}, {pipeline_mode = #tpu.pipeline_mode<synchronous>, transform_indices = @transform_1, window_bounds = array<i64: 128, 128>}, {pipeline_mode = #tpu.pipeline_mode<synchronous>, transform_indices = @transform_2, window_bounds = array<i64: 128, 128>}, {pipeline_mode = #tpu.pipeline_mode<synchronous>, transform_indices = @transform_3, window_bounds = array<i64: 1, 128>}, {pipeline_mode = #tpu.pipeline_mode<synchronous>, transform_indices = @transform_4, window_bounds = array<i64: 128, 128>}, {pipeline_mode = #tpu.pipeline_mode<synchronous>, transform_indices = @transform_5, window_bounds = array<i64: 1, 128>}, {pipeline_mode = #tpu.pipeline_mode<synchronous>, transform_indices = @transform_6, window_bounds = array<i64: 128, 128>}]} {
    %c0 = arith.constant 0 : index
    %c0_0 = arith.constant 0 : index
    %0 = vector.load %arg2[%c0, %c0_0] : memref<128x128xbf16, #tpu.memory_space<vmem>>, vector<128x128xbf16>
    %c0_1 = arith.constant 0 : index
    %c0_2 = arith.constant 0 : index
    %1 = vector.load %arg3[%c0_1, %c0_2] : memref<128x128xbf16, #tpu.memory_space<vmem>>, vector<128x128xbf16>
    %cst = arith.constant dense<0.000000e+00> : vector<128x128xf32>
    %2 = tpu.matmul %0, %1, %cst {dimension_numbers = #tpu.dot_dimension_numbers<[1], [0], [0], [1], [0, 0, 1, 1], [], []>} : vector<128x128xbf16>, vector<128x128xbf16>, vector<128x128xf32> -> vector<128x128xf32>
    %c0_3 = arith.constant 0 : index
    %c0_4 = arith.constant 0 : index
    %3 = vector.load %arg1[%c0_3, %c0_4] : memref<128x128xbf16, #tpu.memory_space<vmem>>, vector<128x128xbf16>
    %4 = arith.truncf %2 : vector<128x128xf32> to vector<128x128xbf16>
    %cst_5 = arith.constant dense<0.000000e+00> : vector<128x128xf32>
    %5 = tpu.matmul %3, %4, %cst_5 {dimension_numbers = #tpu.dot_dimension_numbers<[1], [0], [0], [1], [0, 0, 1, 1], [], []>} : vector<128x128xbf16>, vector<128x128xbf16>, vector<128x128xf32> -> vector<128x128xf32>
    %c0_6 = arith.constant 0 : index
    %c0_7 = arith.constant 0 : index
    %6 = vector.load %arg4[%c0_6, %c0_7] : memref<1x128xf32, #tpu.memory_space<vmem>>, vector<1x128xf32>
    %7 = vector.broadcast %6 : vector<1x128xf32> to vector<128x128xf32>
    %8 = arith.addf %5, %7 : vector<128x128xf32>
    %cst_8 = arith.constant 0.000000e+00 : f32
    %9 = vector.broadcast %cst_8 : f32 to vector<128x128xf32>
    %10 = arith.maximumf %8, %9 : vector<128x128xf32>
    %11 = arith.truncf %10 : vector<128x128xf32> to vector<128x128xbf16>
    %c0_9 = arith.constant 0 : index
    %c0_10 = arith.constant 0 : index
    %12 = vector.load %arg5[%c0_9, %c0_10] : memref<128x128xbf16, #tpu.memory_space<vmem>>, vector<128x128xbf16>
    %cst_11 = arith.constant dense<0.000000e+00> : vector<128x128xf32>
    %13 = tpu.matmul %11, %12, %cst_11 {dimension_numbers = #tpu.dot_dimension_numbers<[1], [0], [0], [1], [0, 0, 1, 1], [], []>} : vector<128x128xbf16>, vector<128x128xbf16>, vector<128x128xf32> -> vector<128x128xf32>
    %c0_12 = arith.constant 0 : index
    %c0_13 = arith.constant 0 : index
    %14 = vector.load %arg1[%c0_12, %c0_13] : memref<128x128xbf16, #tpu.memory_space<vmem>>, vector<128x128xbf16>
    %15 = arith.truncf %13 : vector<128x128xf32> to vector<128x128xbf16>
    %cst_14 = arith.constant dense<0.000000e+00> : vector<128x128xf32>
    %16 = tpu.matmul %14, %15, %cst_14 {dimension_numbers = #tpu.dot_dimension_numbers<[1], [0], [0], [1], [0, 0, 1, 1], [], []>} : vector<128x128xbf16>, vector<128x128xbf16>, vector<128x128xf32> -> vector<128x128xf32>
    %c0_15 = arith.constant 0 : index
    %c0_16 = arith.constant 0 : index
    %17 = vector.load %arg6[%c0_15, %c0_16] : memref<1x128xf32, #tpu.memory_space<vmem>>, vector<1x128xf32>
    %18 = vector.broadcast %17 : vector<1x128xf32> to vector<128x128xf32>
    %19 = arith.addf %16, %18 : vector<128x128xf32>
    %c0_17 = arith.constant 0 : index
    %c0_18 = arith.constant 0 : index
    %20 = vector.load %arg7[%c0_17, %c0_18] : memref<128x128xf32, #tpu.memory_space<vmem>>, vector<128x128xf32>
    tpu.vector_store %arg7[%c0_17, %c0_18], %19 {strides = array<i32>} : memref<128x128xf32, #tpu.memory_space<vmem>>, vector<128x128xf32>,
    return
  }
  func.func @transform_0(%arg0: i32) -> (i32, i32) {
    %c0_i32 = arith.constant 0 : i32
    %c0_i32_0 = arith.constant 0 : i32
    %c0_i32_1 = arith.constant 0 : i32
    return %c0_i32, %c0_i32_0 : i32, i32
  }
  func.func @transform_1(%arg0: i32) -> (i32, i32) {
    %c0_i32 = arith.constant 0 : i32
    %c0_i32_0 = arith.constant 0 : i32
    %c0_i32_1 = arith.constant 0 : i32
    return %c0_i32, %c0_i32_0 : i32, i32
  }
  func.func @transform_2(%arg0: i32) -> (i32, i32) {
    %c0_i32 = arith.constant 0 : i32
    %c0_i32_0 = arith.constant 0 : i32
    %c0_i32_1 = arith.constant 0 : i32
    return %c0_i32, %c0_i32_0 : i32, i32
  }
  func.func @transform_3(%arg0: i32) -> (i32, i32) {
    %c0_i32 = arith.constant 0 : i32
    %c0_i32_0 = arith.constant 0 : i32
    %c0_i32_1 = arith.constant 0 : i32
    return %c0_i32, %c0_i32_0 : i32, i32
  }
  func.func @transform_4(%arg0: i32) -> (i32, i32) {
    %c0_i32 = arith.constant 0 : i32
    %c0_i32_0 = arith.constant 0 : i32
    %c0_i32_1 = arith.constant 0 : i32
    return %c0_i32, %c0_i32_0 : i32, i32
  }
  func.func @transform_5(%arg0: i32) -> (i32, i32) {
    %c0_i32 = arith.constant 0 : i32
    %c0_i32_0 = arith.constant 0 : i32
    %c0_i32_1 = arith.constant 0 : i32
    return %c0_i32, %c0_i32_0 : i32, i32
  }
  func.func @transform_6(%arg0: i32) -> (i32, i32) {
    %c0_i32 = arith.constant 0 : i32
    %c0_i32_0 = arith.constant 0 : i32
    %c0_i32_1 = arith.constant 0 : i32
    return %c0_i32, %c0_i32_0 : i32, i32
  }
}

</mosaic_0001>

<bundles_post_ra>
// kernel: tpu_custom_call.1
= control target key start
LH: loop header
LB: loop body
LE: loop exit
PB: predicated region body
PF: predicated region fallthrough
CT: control target
= control target key end

     0   :  { %11 = vsyncpa [#allocation3], 0  ;;  %s1297_s0 = inlined_call_operand.hbm [shape: bf16[128,128], index: 0, kind: input, shape index: {}]   ;;  %s1298_s1 = inlined_call_operand.hbm [shape: bf16[128,128], index: 1, kind: input, shape index: {}]   ;;  %s1299_s2 = inlined_call_operand.hbm [shape: bf16[128,128], index: 2, kind: input, shape index: {}]   ;;  %s1300_s3 = inlined_call_operand.vmem [shape: f32[1,128], index: 3, kind: input, shape index: {}]   ;;  %s1301_s4 = inlined_call_operand.hbm [shape: bf16[128,128], index: 4, kind: input, shape index: {}]   ;;  %s1302_s5 = inlined_call_operand.vmem [shape: f32[1,128], index: 5, kind: input, shape index: {}]   ;;  %s1303_s6 = inlined_call_operand.hbm [shape: f32[128,128], index: 6, kind: output, shape index: {}]  }
   0x1   :  { %12 = vsyncpa [#allocation6], 0 }
   0x2   :  { %13 = vsyncpa [#allocation9], 0 }
   0x3   :  { %14 = vsyncpa [#allocation4], 0  ;;  %s1188_s21 = smov [#allocation5]   ;;  %s1189_s23 = smov [#allocation2]  }
   0x4   :  { %s32_s22 = sshll.u32 %s1188_s21, 4  ;;  %s20_s24 = sshll.u32 %s1189_s23, 4  ;;  %s33_s22 = int_to_ptr.vmem [resolvable:$true] %s32_s22  ;;  %s21_s24 = int_to_ptr.vmem [resolvable:$true] %s20_s24 }
   0x5   :  { %s1088_s25 = scalar_lea.vmem %s33_s22, 1024  ;;  %p1093_p1 = scmp.lt.s32.totalorder %s33_s22, %s33_s22 }
   0x6   :  { %p1089_p0 = scmp.ne.s32.totalorder %s33_s22, %s1088_s25  ;;  %p1094_p2 = scmp.lt.s32.totalorder %s1088_s25, %s1088_s25 }
   0x8   :  { %p1095_p3 = por %p1094_p2, %p1093_p1 }
   0xa   :  { %p1096_p4 = pnand %p1095_p3, %p1089_p0 }
   0xc   :  { %1099 = shalt.err (!%p1096_p4)
}
   0xd   :  { %s1190_s26 = smov 64   ;;  %s1191_s27 = smov 4  }
   0xe   :  { %38 = dma.hbm_to_vmem [thread:$0]  %s1298_s1, 1024, %s33_s22, [#allocation6], %s1190_s26, %s1190_s26, %s1191_s27  }
   0xf   :  { %s1108_s30 = scalar_lea.vmem %s21_s24, 1024  ;;  %p1113_p6 = scmp.lt.s32.totalorder %s21_s24, %s21_s24 }
  0x10   :  { %p1109_p5 = scmp.ne.s32.totalorder %s21_s24, %s1108_s30  ;;  %p1114_p7 = scmp.lt.s32.totalorder %s1108_s30, %s1108_s30 }
  0x12   :  { %p1115_p8 = por %p1114_p7, %p1113_p6 }
  0x14   :  { %p1116_p9 = pnand %p1115_p8, %p1109_p5 }
  0x16   :  { %1119 = shalt.err (!%p1116_p9)
}
  0x17   :  { %26 = dma.hbm_to_vmem [thread:$0]  %s1297_s0, 1024, %s21_s24, [#allocation3], %s1190_s26, %s1190_s26, %s1191_s27  }
  0x18   :  { %s1192_s9 = smov [#allocation7]   ;;  %s1193_s11 = smov [#allocation8]  }
  0x19   :  { %s44_s10 = sshll.u32 %s1192_s9, 4  ;;  %s58_s12 = sshll.u32 %s1193_s11, 4  ;;  %s45_s10 = int_to_ptr.vmem [resolvable:$true] %s44_s10  ;;  %s59_s12 = int_to_ptr.vmem [resolvable:$true] %s58_s12 }
  0x1a   :  { %s1128_s1 = scalar_lea.vmem %s45_s10, 1024  ;;  %p1133_p11 = scmp.lt.s32.totalorder %s45_s10, %s45_s10 }
  0x1b   :  { %p1129_p10 = scmp.ne.s32.totalorder %s45_s10, %s1128_s1  ;;  %p1134_p12 = scmp.lt.s32.totalorder %s1128_s1, %s1128_s1 }
  0x1d   :  { %p1135_p13 = por %p1134_p12, %p1133_p11 }
  0x1f   :  { %p1136_p0 = pnand %p1135_p13, %p1129_p10 }
  0x21   :  { %1139 = shalt.err (!%p1136_p0)
}
  0x22   :  { %50 = dma.hbm_to_vmem [thread:$0]  %s1299_s2, 1024, %s45_s10, [#allocation6], %s1190_s26, %s1190_s26, %s1191_s27  }
  0x23   :  { %s1148_s0 = scalar_lea.vmem %s59_s12, 1024  ;;  %p1153_p2 = scmp.lt.s32.totalorder %s59_s12, %s59_s12 }
  0x24   :  { %p1149_p1 = scmp.ne.s32.totalorder %s59_s12, %s1148_s0  ;;  %p1154_p3 = scmp.lt.s32.totalorder %s1148_s0, %s1148_s0 }
  0x26   :  { %p1155_p4 = por %p1154_p3, %p1153_p2 }
  0x28   :  { %p1156_p5 = pnand %p1155_p4, %p1149_p1 }
  0x2a   :  { %1159 = shalt.err (!%p1156_p5)
}
  0x2b   :  { %64 = dma.hbm_to_vmem [thread:$0]  %s1301_s4, 1024, %s59_s12, [#allocation9], %s1190_s26, %s1190_s26, %s1191_s27  }
  0x2c   :  { %1180 = dma.done.wait [#allocation3], 1024  }
  0x2d   :  { %1181 = vsyncadd [#allocation3], 4294966272 }
  0x2e   :  { %1182 = dma.done.wait [#allocation6], 2048  }
  0x2f   :  { %1183 = vsyncadd [#allocation6], 4294965248 }
  0x30   :  { %1184 = dma.done.wait [#allocation9], 1024  }
  0x31   :  { %1185 = vsyncadd [#allocation9], 4294966272  ;;  %v1048_v0 = vld [vmem:[#allocation7 + $0x38] sm:$0xff]   ;;  %v1049_v1 = vld [vmem:[#allocation7 + $0x30] sm:$0xff]  }
  0x32   :  { %911 = vmatprep.subr.bf16.mxu0 %v1048_v0  ;;  %v1050_v2 = vld [vmem:[#allocation7 + $0x28] sm:$0xff]   ;;  %v1051_v3 = vld [vmem:[#allocation7 + $0x20] sm:$0xff]   ;;  %v1052_v5 = vld [vmem:[#allocation7 + $0x18] sm:$0xff]  }
  0x33   :  { %912 = vmatpush3.bf16.msra.mxu0 %v1048_v0  ;;  %v1056_v4 = vld [vmem:[#allocation5] sm:$0xff]   ;;  %v1053_v6 = vld [vmem:[#allocation7 + $0x10] sm:$0xff]   ;;  %v1054_v7 = vld [vmem:[#allocation7 + $0x8] sm:$0xff]  }
  0x34   :  { %913 = vmatprep.subr.bf16.mxu0 %v1049_v1  ;;  %927 = vmatprep.mubr.bf16.mxu0 %v1056_v4  ;;  %v1055_v8 = vld [vmem:[#allocation7] sm:$0xff]   ;;  %v1057_v9 = vld [vmem:[#allocation5 + $0x8] sm:$0xff]   ;;  %v1058_v10 = vld [vmem:[#allocation5 + $0x10] sm:$0xff]  }
  0x35   :  { %v1059_v11 = vld [vmem:[#allocation5 + $0x18] sm:$0xff]   ;;  %v1060_v12 = vld [vmem:[#allocation5 + $0x20] sm:$0xff]   ;;  %v1061_v13 = vld [vmem:[#allocation5 + $0x28] sm:$0xff]  }
  0x36   :  { %v1062_v14 = vld [vmem:[#allocation5 + $0x30] sm:$0xff]   ;;  %v1063_v15 = vld [vmem:[#allocation5 + $0x38] sm:$0xff]   ;;  %v1256_v16 = vld [vmem:[#allocation2] sm:$0xff]  }
  0x37   :  { %914 = vmatpush3.bf16.msra.mxu0 %v1049_v1  ;;  %959 = vmatprep.mubr.bf16.mxu1 %v1256_v16  ;;  %v1072_v17 = vld [vmem:[#allocation8 + $0x38] sm:$0xff]   ;;  %v1073_v18 = vld [vmem:[#allocation8 + $0x30] sm:$0xff]   ;;  %v1074_v19 = vld [vmem:[#allocation8 + $0x28] sm:$0xff]  }
  0x38   :  { %915 = vmatprep.subr.bf16.mxu0 %v1050_v2  ;;  %v1075_v20 = vld [vmem:[#allocation8 + $0x20] sm:$0xff]   ;;  %v1076_v21 = vld [vmem:[#allocation8 + $0x18] sm:$0xff]   ;;  %v1259_v46 = vld [vmem:[#allocation2 + $0x8] sm:$0xff]  }
  0x39   :  { %v1261_v47 = vld [vmem:[#allocation2 + $0x10] sm:$0xff]   ;;  %v1265_v48 = vld [vmem:[#allocation2 + $0x18] sm:$0xff]   ;;  %v1267_v49 = vld [vmem:[#allocation2 + $0x20] sm:$0xff]  }
  0x3a   :  { %v1271_v50 = vld [vmem:[#allocation2 + $0x28] sm:$0xff]   ;;  %v1273_v51 = vld [vmem:[#allocation2 + $0x30] sm:$0xff]   ;;  %v1277_v52 = vld [vmem:[#allocation2 + $0x38] sm:$0xff]  }
  0x3b   :  { %916 = vmatpush3.bf16.msra.mxu0 %v1050_v2  ;;  %v1077_v53 = vld [vmem:[#allocation8 + $0x10] sm:$0xff]   ;;  %v1078_v54 = vld [vmem:[#allocation8 + $0x8] sm:$0xff]   ;;  %v1079_v55 = vld [vmem:[#allocation8] sm:$0xff]  }
  0x3c   :  { %917 = vmatprep.subr.bf16.mxu0 %v1051_v3  ;;  %v829_v58 = vld [vmem:[%s1300_s3] ss:$0 sm:$0xff] }
  0x3f   :  { %918 = vmatpush3.bf16.msra.mxu0 %v1051_v3 }
  0x40   :  { %919 = vmatprep.subr.bf16.mxu0 %v1052_v5 }
  0x43   :  { %920 = vmatpush3.bf16.msra.mxu0 %v1052_v5 }
  0x44   :  { %921 = vmatprep.subr.bf16.mxu0 %v1053_v6 }
  0x47   :  { %922 = vmatpush3.bf16.msra.mxu0 %v1053_v6 }
  0x48   :  { %923 = vmatprep.subr.bf16.mxu0 %v1054_v7 }
  0x4b   :  { %924 = vmatpush3.bf16.msra.mxu0 %v1054_v7 }
  0x4c   :  { %925 = vmatprep.subr.bf16.mxu0 %v1055_v8 }
  0x4f   :  { %926 = vmatpush3.bf16.msra.mxu0 %v1055_v8 }
  0x50   :  { %975 = vmatprep.subr.bf16.mxu0 %v1072_v17 }
  0x52   :  { %928 = vmatmul.mubr.bf16.vlgmr.msra.gmra.mxu0 %v1057_v9 }
  0x53   :  { %931 = vmatprep.mubr.bf16.mxu0 %v1058_v10  ;;  %976 = vmatpush3.bf16.msra.mxu0 %v1072_v17 }
  0x54   :  { %977 = vmatprep.subr.bf16.mxu0 %v1073_v18 }
  0x57   :  { %978 = vmatpush3.bf16.msra.mxu0 %v1073_v18 }
  0x58   :  { %979 = vmatprep.subr.bf16.mxu0 %v1074_v19 }
  0x5a   :  { %932 = vmatmul.mubr.bf16.gmra.mxu0 %v1059_v11 }
  0x5b   :  { %935 = vmatprep.mubr.bf16.mxu0 %v1060_v12  ;;  %980 = vmatpush3.bf16.msra.mxu0 %v1074_v19 }
  0x5c   :  { %981 = vmatprep.subr.bf16.mxu0 %v1075_v20 }
  0x5f   :  { %982 = vmatpush3.bf16.msra.mxu0 %v1075_v20 }
  0x60   :  { %983 = vmatprep.subr.bf16.mxu0 %v1076_v21 }
  0x62   :  { %936 = vmatmul.mubr.bf16.gmra.mxu0 %v1061_v13 }
  0x63   :  { %939 = vmatprep.mubr.bf16.mxu0 %v1062_v14  ;;  %984 = vmatpush3.bf16.msra.mxu0 %v1076_v21 }
  0x64   :  { %985 = vmatprep.subr.bf16.mxu0 %v1077_v53 }
  0x67   :  { %986 = vmatpush3.bf16.msra.mxu0 %v1077_v53 }
  0x68   :  { %987 = vmatprep.subr.bf16.mxu0 %v1078_v54 }
  0x6a   :  { %940 = vmatmul.mubr.bf16.gmra.mxu0 %v1063_v15 }
  0x6b   :  { %988 = vmatpush3.bf16.msra.mxu0 %v1078_v54 }
  0x6c   :  { %989 = vmatprep.subr.bf16.mxu0 %v1079_v55 }
  0x6f   :  { %990 = vmatpush3.bf16.msra.mxu0 %v1079_v55 }
 0x112   :  { %v929_v22 = vpop.f32.mrf.mxu0 }
 0x114   :  { %v242_v23 = vpop.f32.mrf.mxu0 }
 0x116   :  { %v930_v24 = vpop.f32.mrf.mxu0 }
 0x117   :  { %v322_v44 = vpack.c.bf16 %v930_v24, %v929_v22 }
 0x118   :  { %v245_v25 = vpop.f32.mrf.mxu0 }
 0x119   :  { %v321_v45 = vpack.c.bf16 %v245_v25, %v242_v23 }
 0x11a   :  { %v933_v26 = vpop.f32.mrf.mxu0 }
 0x11c   :  { %v258_v27 = vpop.f32.mrf.mxu0 }
 0x11e   :  { %v934_v28 = vpop.f32.mrf.mxu0 }
 0x11f   :  { %v324_v42 = vpack.c.bf16 %v934_v28, %v933_v26 }
 0x120   :  { %v261_v29 = vpop.f32.mrf.mxu0 }
 0x121   :  { %v323_v43 = vpack.c.bf16 %v261_v29, %v258_v27 }
 0x122   :  { %v937_v30 = vpop.f32.mrf.mxu0 }
 0x124   :  { %v274_v31 = vpop.f32.mrf.mxu0 }
 0x126   :  { %v938_v32 = vpop.f32.mrf.mxu0 }
 0x127   :  { %v326_v40 = vpack.c.bf16 %v938_v32, %v937_v30 }
 0x128   :  { %v277_v33 = vpop.f32.mrf.mxu0 }
 0x129   :  { %v325_v41 = vpack.c.bf16 %v277_v33, %v274_v31 }
 0x12a   :  { %v941_v34 = vpop.f32.mrf.mxu0 }
 0x12c   :  { %v290_v35 = vpop.f32.mrf.mxu0 }
 0x12e   :  { %v942_v36 = vpop.f32.mrf.mxu0 }
 0x12f   :  { %v328_v37 = vpack.c.bf16 %v942_v36, %v941_v34 }
 0x130   :  { %v293_v38 = vpop.f32.mrf.mxu0 }
 0x131   :  { %v327_v39 = vpack.c.bf16 %v293_v38, %v290_v35  ;;  %943 = vmatprep.subr.bf16.mxu1 %v328_v37 }
 0x132   :  { %944 = vmatpush3.bf16.msra.mxu1 %v328_v37 }
 0x133   :  { %945 = vmatprep.subr.bf16.mxu1 %v327_v39 }
 0x136   :  { %946 = vmatpush3.bf16.msra.mxu1 %v327_v39 }
 0x137   :  { %947 = vmatprep.subr.bf16.mxu1 %v326_v40 }
 0x13a   :  { %948 = vmatpush3.bf16.msra.mxu1 %v326_v40 }
 0x13b   :  { %949 = vmatprep.subr.bf16.mxu1 %v325_v41 }
 0x13e   :  { %950 = vmatpush3.bf16.msra.mxu1 %v325_v41 }
 0x13f   :  { %951 = vmatprep.subr.bf16.mxu1 %v324_v42 }
 0x142   :  { %952 = vmatpush3.bf16.msra.mxu1 %v324_v42 }
 0x143   :  { %953 = vmatprep.subr.bf16.mxu1 %v323_v43 }
 0x146   :  { %954 = vmatpush3.bf16.msra.mxu1 %v323_v43 }
 0x147   :  { %955 = vmatprep.subr.bf16.mxu1 %v322_v44 }
 0x14a   :  { %956 = vmatpush3.bf16.msra.mxu1 %v322_v44 }
 0x14b   :  { %957 = vmatprep.subr.bf16.mxu1 %v321_v45 }
 0x14e   :  { %958 = vmatpush3.bf16.msra.mxu1 %v321_v45 }
 0x151   :  { %960 = vmatmul.mubr.bf16.vlgmr.msra.gmra.mxu1 %v1259_v46 }
 0x152   :  { %963 = vmatprep.mubr.bf16.mxu1 %v1261_v47 }
 0x159   :  { %964 = vmatmul.mubr.bf16.gmra.mxu1 %v1265_v48 }
 0x15a   :  { %967 = vmatprep.mubr.bf16.mxu1 %v1267_v49 }
 0x161   :  { %968 = vmatmul.mubr.bf16.gmra.mxu1 %v1271_v50 }
 0x162   :  { %971 = vmatprep.mubr.bf16.mxu1 %v1273_v51 }
 0x169   :  { %972 = vmatmul.mubr.bf16.gmra.mxu1 %v1277_v52 }
 0x16a   :  { %1023 = vmatprep.mubr.bf16.mxu1 %v1256_v16 }
 0x211   :  { %v961_v56 = vpop.f32.mrf.mxu1 }
 0x212   :  { %v427_v62 = vadd.f32 %v961_v56, %v829_v58 }
 0x213   :  { %v418_v57 = vpop.f32.mrf.mxu1 }
 0x214   :  { %v419_v60 = vadd.f32 %v829_v58, %v418_v57  ;;  %v483_v5 = vmax.f32 %v427_v62, 0.0 }
 0x215   :  { %v962_v59 = vpop.f32.mrf.mxu1 }
 0x216   :  { %v430_v61 = vadd.f32 %v962_v59, %v829_v58  ;;  %v481_v3 = vmax.f32 %v419_v60, 0.0 }
 0x217   :  { %v421_v63 = vpop.f32.mrf.mxu1 }
 0x218   :  { %v422_v0 = vadd.f32 %v829_v58, %v421_v63  ;;  %v484_v1 = vmax.f32 %v430_v61, 0.0 }
 0x219   :  { %v965_v2 = vpop.f32.mrf.mxu1 }
 0x21a   :  { %v482_v4 = vmax.f32 %v422_v0, 0.0  ;;  %v498_v8 = vpack.c.bf16 %v484_v1, %v483_v5  ;;  %v443_v12 = vadd.f32 %v965_v2, %v829_v58 }
 0x21b   :  { %v434_v6 = vpop.f32.mrf.mxu1 }
 0x21c   :  { %v497_v7 = vpack.c.bf16 %v482_v4, %v481_v3  ;;  %v435_v10 = vadd.f32 %v829_v58, %v434_v6  ;;  %v487_v19 = vmax.f32 %v443_v12, 0.0 }
 0x21d   :  { %v966_v9 = vpop.f32.mrf.mxu1 }
 0x21e   :  { %v446_v11 = vadd.f32 %v966_v9, %v829_v58  ;;  %991 = vmatprep.mubr.bf16.mxu0 %v497_v7  ;;  %v485_v17 = vmax.f32 %v435_v10, 0.0 }
 0x21f   :  { %v437_v13 = vpop.f32.mrf.mxu1  ;;  %992 = vmatmul.mubr.bf16.vlgmr.msra.gmra.mxu0 %v498_v8 }
 0x220   :  { %v438_v14 = vadd.f32 %v829_v58, %v437_v13  ;;  %v488_v15 = vmax.f32 %v446_v11, 0.0 }
 0x221   :  { %v969_v16 = vpop.f32.mrf.mxu1 }
 0x222   :  { %v486_v18 = vmax.f32 %v438_v14, 0.0  ;;  %v500_v22 = vpack.c.bf16 %v488_v15, %v487_v19  ;;  %v459_v26 = vadd.f32 %v969_v16, %v829_v58  ;;  %v846_v16 = vld [vmem:[%s1302_s5] ss:$0 sm:$0xff]  ;;  %s1194_s5 = smov [#allocation10]  }
 0x223   :  { %v450_v20 = vpop.f32.mrf.mxu1  ;;  %s799_s18 = sshll.u32 %s1194_s5, 4  ;;  %s800_s18 = int_to_ptr.vmem [resolvable:$true] %s799_s18 }
 0x224   :  { %v499_v21 = vpack.c.bf16 %v486_v18, %v485_v17  ;;  %v451_v24 = vadd.f32 %v829_v58, %v450_v20  ;;  %v491_v33 = vmax.f32 %v459_v26, 0.0  ;;  %s1160_s19 = scalar_lea.vmem %s800_s18, 2048  ;;  %p1165_p7 = scmp.lt.s32.totalorder %s800_s18, %s800_s18 }
 0x225   :  { %v970_v23 = vpop.f32.mrf.mxu1  ;;  %p1161_p6 = scmp.ne.s32.totalorder %s800_s18, %s1160_s19  ;;  %p1166_p8 = scmp.lt.s32.totalorder %s1160_s19, %s1160_s19 }
 0x226   :  { %v462_v25 = vadd.f32 %v970_v23, %v829_v58  ;;  %995 = vmatprep.mubr.bf16.mxu0 %v499_v21  ;;  %v489_v31 = vmax.f32 %v451_v24, 0.0 }
 0x227   :  { %v453_v27 = vpop.f32.mrf.mxu1  ;;  %996 = vmatmul.mubr.bf16.gmra.mxu0 %v500_v22  ;;  %p1167_p9 = por %p1166_p8, %p1165_p7 }
 0x228   :  { %v454_v28 = vadd.f32 %v829_v58, %v453_v27  ;;  %v492_v29 = vmax.f32 %v462_v25, 0.0 }
 0x229   :  { %v973_v30 = vpop.f32.mrf.mxu1  ;;  %p1168_p10 = pnand %p1167_p9, %p1161_p6 }
 0x22a   :  { %v490_v32 = vmax.f32 %v454_v28, 0.0  ;;  %v502_v36 = vpack.c.bf16 %v492_v29, %v491_v33  ;;  %v475_v40 = vadd.f32 %v973_v30, %v829_v58 }
 0x22b   :  { %v466_v34 = vpop.f32.mrf.mxu1 }
 0x22c   :  { %v501_v35 = vpack.c.bf16 %v490_v32, %v489_v31  ;;  %v467_v38 = vadd.f32 %v829_v58, %v466_v34  ;;  %v495_v53 = vmax.f32 %v475_v40, 0.0 }
 0x22d   :  { %v974_v37 = vpop.f32.mrf.mxu1 }
 0x22e   :  { %v478_v39 = vadd.f32 %v974_v37, %v829_v58  ;;  %999 = vmatprep.mubr.bf16.mxu0 %v501_v35  ;;  %v493_v44 = vmax.f32 %v467_v38, 0.0 }
 0x22f   :  { %v469_v41 = vpop.f32.mrf.mxu1  ;;  %1000 = vmatmul.mubr.bf16.gmra.mxu0 %v502_v36 }
 0x230   :  { %v470_v42 = vadd.f32 %v829_v58, %v469_v41  ;;  %v496_v43 = vmax.f32 %v478_v39, 0.0 }
 0x232   :  { %v494_v45 = vmax.f32 %v470_v42, 0.0  ;;  %v504_v55 = vpack.c.bf16 %v496_v43, %v495_v53 }
 0x234   :  { %v503_v54 = vpack.c.bf16 %v494_v45, %v493_v44 }
 0x236   :  { %1003 = vmatprep.mubr.bf16.mxu0 %v503_v54 }
 0x237   :  { %1004 = vmatmul.mubr.bf16.gmra.mxu0 %v504_v55 }
 0x2df   :  { %v993_v56 = vpop.f32.mrf.mxu0 }
 0x2e1   :  { %v603_v57 = vpop.f32.mrf.mxu0 }
 0x2e3   :  { %v994_v59 = vpop.f32.mrf.mxu0 }
 0x2e4   :  { %v667_v14 = vpack.c.bf16 %v994_v59, %v993_v56 }
 0x2e5   :  { %v606_v60 = vpop.f32.mrf.mxu0 }
 0x2e6   :  { %v666_v15 = vpack.c.bf16 %v606_v60, %v603_v57 }
 0x2e7   :  { %v997_v61 = vpop.f32.mrf.mxu0 }
 0x2e9   :  { %v619_v62 = vpop.f32.mrf.mxu0 }
 0x2eb   :  { %v998_v63 = vpop.f32.mrf.mxu0 }
 0x2ec   :  { %v669_v12 = vpack.c.bf16 %v998_v63, %v997_v61 }
 0x2ed   :  { %v622_v0 = vpop.f32.mrf.mxu0 }
 0x2ee   :  { %v668_v13 = vpack.c.bf16 %v622_v0, %v619_v62 }
 0x2ef   :  { %v1001_v1 = vpop.f32.mrf.mxu0 }
 0x2f1   :  { %v635_v2 = vpop.f32.mrf.mxu0 }
 0x2f3   :  { %v1002_v3 = vpop.f32.mrf.mxu0 }
 0x2f4   :  { %v671_v10 = vpack.c.bf16 %v1002_v3, %v1001_v1 }
 0x2f5   :  { %v638_v58 = vpop.f32.mrf.mxu0 }
 0x2f6   :  { %v670_v11 = vpack.c.bf16 %v638_v58, %v635_v2 }
 0x2f7   :  { %v1005_v4 = vpop.f32.mrf.mxu0 }
 0x2f9   :  { %v651_v5 = vpop.f32.mrf.mxu0 }
 0x2fb   :  { %v1006_v6 = vpop.f32.mrf.mxu0 }
 0x2fc   :  { %v673_v7 = vpack.c.bf16 %v1006_v6, %v1005_v4 }
 0x2fd   :  { %v654_v8 = vpop.f32.mrf.mxu0 }
 0x2fe   :  { %v672_v9 = vpack.c.bf16 %v654_v8, %v651_v5  ;;  %1007 = vmatprep.subr.bf16.mxu1 %v673_v7 }
 0x2ff   :  { %1008 = vmatpush3.bf16.msra.mxu1 %v673_v7 }
 0x300   :  { %1009 = vmatprep.subr.bf16.mxu1 %v672_v9 }
 0x303   :  { %1010 = vmatpush3.bf16.msra.mxu1 %v672_v9 }
 0x304   :  { %1011 = vmatprep.subr.bf16.mxu1 %v671_v10 }
 0x307   :  { %1012 = vmatpush3.bf16.msra.mxu1 %v671_v10 }
 0x308   :  { %1013 = vmatprep.subr.bf16.mxu1 %v670_v11 }
 0x30b   :  { %1014 = vmatpush3.bf16.msra.mxu1 %v670_v11 }
 0x30c   :  { %1015 = vmatprep.subr.bf16.mxu1 %v669_v12 }
 0x30f   :  { %1016 = vmatpush3.bf16.msra.mxu1 %v669_v12 }
 0x310   :  { %1017 = vmatprep.subr.bf16.mxu1 %v668_v13 }
 0x313   :  { %1018 = vmatpush3.bf16.msra.mxu1 %v668_v13 }
 0x314   :  { %1019 = vmatprep.subr.bf16.mxu1 %v667_v14 }
 0x317   :  { %1020 = vmatpush3.bf16.msra.mxu1 %v667_v14 }
 0x318   :  { %1021 = vmatprep.subr.bf16.mxu1 %v666_v15 }
 0x31b   :  { %1022 = vmatpush3.bf16.msra.mxu1 %v666_v15 }
 0x31e   :  { %1024 = vmatmul.mubr.bf16.vlgmr.msra.gmra.mxu1 %v1259_v46 }
 0x31f   :  { %1027 = vmatprep.mubr.bf16.mxu1 %v1261_v47 }
 0x326   :  { %1028 = vmatmul.mubr.bf16.gmra.mxu1 %v1265_v48 }
 0x327   :  { %1031 = vmatprep.mubr.bf16.mxu1 %v1267_v49 }
 0x32e   :  { %1032 = vmatmul.mubr.bf16.gmra.mxu1 %v1271_v50 }
 0x32f   :  { %1035 = vmatprep.mubr.bf16.mxu1 %v1273_v51 }
 0x336   :  { %1036 = vmatmul.mubr.bf16.gmra.mxu1 %v1277_v52 }
 0x3de   :  { %v1025_v17 = vpop.f32.mrf.mxu1 }
 0x3df   :  { %v724_v18 = vadd.f32 %v1025_v17, %v846_v16 }
 0x3e0   :  { %v715_v19 = vpop.f32.mrf.mxu1 }
 0x3e1   :  { %780 = vst [vmem:[#allocation10 + $0x10] sm:$0xff] %v724_v18  ;;  %v716_v46 = vadd.f32 %v846_v16, %v715_v19 }
 0x3e2   :  { %v1026_v47 = vpop.f32.mrf.mxu1 }
 0x3e3   :  { %778 = vst [vmem:[#allocation10] sm:$0xff] %v716_v46  ;;  %v727_v48 = vadd.f32 %v1026_v47, %v846_v16 }
 0x3e4   :  { %v718_v20 = vpop.f32.mrf.mxu1 }
 0x3e5   :  { %781 = vst [vmem:[#allocation10 + $0x18] sm:$0xff] %v727_v48  ;;  %v719_v49 = vadd.f32 %v846_v16, %v718_v20 }
 0x3e6   :  { %v1029_v50 = vpop.f32.mrf.mxu1 }
 0x3e7   :  { %779 = vst [vmem:[#allocation10 + $0x8] sm:$0xff] %v719_v49  ;;  %v740_v51 = vadd.f32 %v1029_v50, %v846_v16 }
 0x3e8   :  { %v731_v21 = vpop.f32.mrf.mxu1 }
 0x3e9   :  { %784 = vst [vmem:[#allocation10 + $0x30] sm:$0xff] %v740_v51  ;;  %v732_v52 = vadd.f32 %v846_v16, %v731_v21 }
 0x3ea   :  { %v1030_v22 = vpop.f32.mrf.mxu1 }
 0x3eb   :  { %782 = vst [vmem:[#allocation10 + $0x20] sm:$0xff] %v732_v52  ;;  %v743_v23 = vadd.f32 %v1030_v22, %v846_v16 }
 0x3ec   :  { %v734_v24 = vpop.f32.mrf.mxu1 }
 0x3ed   :  { %785 = vst [vmem:[#allocation10 + $0x38] sm:$0xff] %v743_v23  ;;  %v735_v25 = vadd.f32 %v846_v16, %v734_v24 }
 0x3ee   :  { %v1033_v26 = vpop.f32.mrf.mxu1 }
 0x3ef   :  { %783 = vst [vmem:[#allocation10 + $0x28] sm:$0xff] %v735_v25  ;;  %v756_v27 = vadd.f32 %v1033_v26, %v846_v16 }
 0x3f0   :  { %v747_v28 = vpop.f32.mrf.mxu1 }
 0x3f1   :  { %788 = vst [vmem:[#allocation10 + $0x50] sm:$0xff] %v756_v27  ;;  %v748_v29 = vadd.f32 %v846_v16, %v747_v28 }
 0x3f2   :  { %v1034_v30 = vpop.f32.mrf.mxu1 }
 0x3f3   :  { %786 = vst [vmem:[#allocation10 + $0x40] sm:$0xff] %v748_v29  ;;  %v759_v31 = vadd.f32 %v1034_v30, %v846_v16 }
 0x3f4   :  { %v750_v32 = vpop.f32.mrf.mxu1 }
 0x3f5   :  { %789 = vst [vmem:[#allocation10 + $0x58] sm:$0xff] %v759_v31  ;;  %v751_v33 = vadd.f32 %v846_v16, %v750_v32 }
 0x3f6   :  { %v1037_v34 = vpop.f32.mrf.mxu1 }
 0x3f7   :  { %787 = vst [vmem:[#allocation10 + $0x48] sm:$0xff] %v751_v33  ;;  %v772_v35 = vadd.f32 %v1037_v34, %v846_v16 }
 0x3f8   :  { %v763_v36 = vpop.f32.mrf.mxu1 }
 0x3f9   :  { %792 = vst [vmem:[#allocation10 + $0x70] sm:$0xff] %v772_v35  ;;  %v764_v37 = vadd.f32 %v846_v16, %v763_v36 }
 0x3fa   :  { %v1038_v38 = vpop.f32.mrf.mxu1 }
 0x3fb   :  { %790 = vst [vmem:[#allocation10 + $0x60] sm:$0xff] %v764_v37  ;;  %v775_v39 = vadd.f32 %v1038_v38, %v846_v16 }
 0x3fc   :  { %v766_v40 = vpop.f32.mrf.mxu1 }
 0x3fd   :  { %793 = vst [vmem:[#allocation10 + $0x78] sm:$0xff] %v775_v39  ;;  %v767_v41 = vadd.f32 %v846_v16, %v766_v40 }
 0x3ff   :  { %791 = vst [vmem:[#allocation10 + $0x68] sm:$0xff] %v767_v41 }
 0x400   :  { %1171 = shalt.err (!%p1168_p10)
}
 0x401   :  { %s1195_s20 = smov 128   ;;  %s1196_s21 = smov 8  }
 0x402   :  { %805 = dma.vmem_to_hbm [thread:$0]  %s800_s18, 2048, %s1303_s6, [#allocation4], %s1195_s20, %s1195_s20, %s1196_s21  }
 0x403   :  { %1186 = dma.done.wait [#allocation4], 2048  }
 0x404   :  { %1187 = vsyncadd [#allocation4], 4294965248 }
 0x405   :  { %809 = vsyncpa [#allocation3], 1 }
 0x406   :  { %810 = vsyncpa [#allocation6], 1 }
 0x407   :  { %811 = vsyncpa [#allocation9], 1 }
 0x408   :  { %812 = vsyncpa [#allocation4], 1 }

</bundles_post_ra>
